<compile_context>
chip_gen: v7x
topology: tpu7x:2x2x1
jax: 0.10.0
libtpu: 0.0.40
codegen_flags: <defaults>
</compile_context>

<pallas_src>
import functools

import jax
import jax.numpy as jnp
from jax import lax
from jax.experimental import pallas as pl
from jax.experimental.pallas import tpu as pltpu


def _mha_flash_kernel(xq_ref, xkv_ref, wq_ref, wk_ref, wv_ref, wp_ref, bp_ref,
                      o_ref, q_sc, m_sc, l_sc, acc_sc, out_sc, *, compute_dtype):
    """One (batch, q-tile, head, kv-tile) step of causal MHA with online softmax."""
    iq = pl.program_id(1)
    ih = pl.program_id(2)
    ik = pl.program_id(3)
    num_heads = pl.num_programs(2)
    num_kv = pl.num_programs(3)
    tq = xq_ref.shape[1]
    tk = xkv_ref.shape[1]

    # Start of a (batch, q-tile): zero the cross-head output accumulator.
    @pl.when((ih == 0) & (ik == 0))
    def _():
        out_sc[...] = jnp.zeros_like(out_sc)

    # Start of a (batch, q-tile, head): project Q once (1/sqrt(hs) is pre-folded
    # into the weights) and reset the online-softmax state.
    @pl.when(ik == 0)
    def _():
        q_sc[...] = jnp.dot(xq_ref[0], wq_ref[0],
                            preferred_element_type=jnp.float32).astype(compute_dtype)
        m_sc[...] = jnp.full_like(m_sc, -jnp.inf)
        l_sc[...] = jnp.zeros_like(l_sc)
        acc_sc[...] = jnp.zeros_like(acc_sc)

    q_start = iq * tq
    k_start = ik * tk

    # Skip KV tiles that lie strictly above the causal diagonal.
    @pl.when(q_start + (tq - 1) >= k_start)
    def _():
        xkv = xkv_ref[0]
        k = jnp.dot(xkv, wk_ref[0],
                    preferred_element_type=jnp.float32).astype(compute_dtype)
        v = jnp.dot(xkv, wv_ref[0],
                    preferred_element_type=jnp.float32).astype(compute_dtype)

        # Scores (tq, tk): contract on the head dim (q already carries the scale).
        s = lax.dot_general(q_sc[...], k, (((1,), (1,)), ((), ())),
                            preferred_element_type=jnp.float32)
        rows = q_start + lax.broadcasted_iota(jnp.int32, (tq, tk), 0)
        cols = k_start + lax.broadcasted_iota(jnp.int32, (tq, tk), 1)
        s = jnp.where(rows >= cols, s, jnp.float32(-1e30))

        # Online softmax update (all f32).
        m_prev = m_sc[...]
        m_new = jnp.maximum(m_prev, jnp.max(s, axis=-1, keepdims=True))
        alpha = jnp.exp(m_prev - m_new)
        p = jnp.exp(s - m_new)
        l_sc[...] = alpha * l_sc[...] + jnp.sum(p, axis=-1, keepdims=True)
        acc_sc[...] = alpha * acc_sc[...] + jnp.dot(
            p.astype(compute_dtype), v, preferred_element_type=jnp.float32)
        m_sc[...] = m_new

    # End of the KV loop for this head: normalize and fold this head's slice of the
    # output projection into the shared accumulator (concat becomes a sum of dots).
    @pl.when(ik == num_kv - 1)
    def _():
        o_h = acc_sc[...] * pl.reciprocal(l_sc[...], approx=True)
        out_sc[...] += jnp.dot(o_h.astype(compute_dtype), wp_ref[0],
                               preferred_element_type=jnp.float32)

    # Last head, last KV tile: add the projection bias and emit the output tile.
    @pl.when((ih == num_heads - 1) & (ik == num_kv - 1))
    def _():
        o_ref[0] = (out_sc[...] + bp_ref[...]).astype(o_ref.dtype)


def _pick_tile(t, target=256):
    for cand in (target, 128, 64, 32, 16, 8):
        if cand <= t and t % cand == 0:
            return cand
    return t


@functools.partial(jax.jit, static_argnames=("tq", "tk", "compute_dtype"))
def mha_forward(x, wq, wk, wv, wp_h, bp, *, tq=None, tk=None,
                compute_dtype=jnp.bfloat16):
    """Causal multi-head attention forward.

    x:    (B, T, D)   activations
    wq:   (H, D, hs)  per-head query weights, 1/sqrt(hs) pre-folded
    wk:   (H, D, hs)  per-head key weights
    wv:   (H, D, hs)  per-head value weights
    wp_h: (H, hs, D)  output projection split per head (proj.weight.T reshaped)
    bp:   (1, D)      output projection bias
    """
    b, t, d = x.shape
    nh, _, hs = wq.shape
    tq = _pick_tile(t) if tq is None else tq
    tk = _pick_tile(t) if tk is None else tk
    assert t % tq == 0 and t % tk == 0, (t, tq, tk)
    num_q, num_kv = t // tq, t // tk

    cdt = jnp.dtype(compute_dtype)
    x_c = x.astype(cdt)                       # halves HBM->VMEM traffic when bf16
    wq_c = wq.astype(cdt)
    wk_c = wk.astype(cdt)
    wv_c = wv.astype(cdt)
    wp_c = wp_h.astype(cdt)
    bp_f32 = bp.astype(jnp.float32)

    # K/V tiles stream every inner step; triple-buffer them only when there are
    # enough KV iterations for the extra buffer to hide DMA latency.
    kv_kwargs = {"pipeline_mode": pl.Buffered(3)} if num_kv >= 3 else {}

    in_specs = [
        pl.BlockSpec((1, tq, d), lambda b_, q_, h_, k_: (b_, q_, 0)),   # x (Q rows)
        pl.BlockSpec((1, tk, d), lambda b_, q_, h_, k_: (b_, k_, 0),
                     **kv_kwargs),                                      # x (K/V rows)
        pl.BlockSpec((1, d, hs), lambda b_, q_, h_, k_: (h_, 0, 0)),    # Wq (scaled)
        pl.BlockSpec((1, d, hs), lambda b_, q_, h_, k_: (h_, 0, 0)),    # Wk
        pl.BlockSpec((1, d, hs), lambda b_, q_, h_, k_: (h_, 0, 0)),    # Wv
        pl.BlockSpec((1, hs, d), lambda b_, q_, h_, k_: (h_, 0, 0)),    # Wp slice
        pl.BlockSpec((1, d), lambda b_, q_, h_, k_: (0, 0)),            # bias
    ]
    out_spec = pl.BlockSpec((1, tq, d), lambda b_, q_, h_, k_: (b_, q_, 0))

    scratch = [
        pltpu.VMEM((tq, hs), cdt),            # per-head Q tile (reused across KV)
        pltpu.VMEM((tq, 1), jnp.float32),     # online-softmax running max
        pltpu.VMEM((tq, 1), jnp.float32),     # online-softmax running sum
        pltpu.VMEM((tq, hs), jnp.float32),    # per-head attention accumulator
        pltpu.VMEM((tq, d), jnp.float32),     # cross-head output accumulator
    ]

    # Explicit VMEM budget (v7x has only 64 MiB physical): tile footprint x margin.
    cb = cdt.itemsize
    est = (2 * cb * tq * d + 3 * cb * tk * d                   # x tiles (multi-buffered)
           + 2 * cb * (3 * d * hs + hs * d) + 2 * 4 * d        # weights + bias
           + 2 * 4 * tq * d                                    # output tile
           + cb * tq * hs + 4 * (2 * tq + tq * hs + tq * d))   # scratch
    vmem_limit = int(min(max(4 * est, 8 * 1024 * 1024), 100 * 1024 * 1024))

    kernel = functools.partial(_mha_flash_kernel, compute_dtype=cdt)
    return pl.pallas_call(
        kernel,
        out_shape=jax.ShapeDtypeStruct((b, t, d), x.dtype),
        grid_spec=pltpu.PrefetchScalarGridSpec(
            num_scalar_prefetch=0,
            grid=(b, num_q, nh, num_kv),
            in_specs=in_specs,
            out_specs=out_spec,
            scratch_shapes=scratch,
        ),
        compiler_params=pltpu.CompilerParams(
            dimension_semantics=("parallel", "parallel", "arbitrary", "arbitrary"),
            vmem_limit_bytes=vmem_limit,
        ),
    )(x_c, x_c, wq_c, wk_c, wv_c, wp_c, bp_f32)


def mha_reference(x, wq_heads, wk_heads, wv_heads, wp, bp, head_size):
    """Pure-JAX mirror of MultiHeadAttention.forward (eval mode, masked=True)."""
    hp = lax.Precision.HIGHEST
    b, t, _ = x.shape
    mask = jnp.tril(jnp.ones((t, t), dtype=bool))
    outs = []
    for h in range(wq_heads.shape[0]):
        q = jnp.einsum("btd,kd->btk", x, wq_heads[h], precision=hp)
        k = jnp.einsum("btd,kd->btk", x, wk_heads[h], precision=hp)
        v = jnp.einsum("btd,kd->btk", x, wv_heads[h], precision=hp)
        wei = jnp.einsum("btk,bsk->bts", q, k, precision=hp) * head_size ** -0.5
        wei = jnp.where(mask, wei, -jnp.inf)
        wei = jax.nn.softmax(wei, axis=-1)
        outs.append(jnp.einsum("bts,bsk->btk", wei, v, precision=hp))
    cat = jnp.concatenate(outs, axis=-1)
    return jnp.einsum("btd,ed->bte", cat, wp, precision=hp) + bp


if __name__ == "__main__":
    B, T = 2, 8
    n_heads, head_size = 4, 8
    d_model = n_heads * head_size            # 32

    key = jax.random.PRNGKey(0)
    keys = jax.random.split(key, 6)
    x = jax.random.normal(keys[0], (B, T, d_model), jnp.float32)

    # Per-head Linear weights in the PyTorch layout: (head_size, d_model), y = x @ W^T.
    wq_heads = jax.random.normal(keys[1], (n_heads, head_size, d_model), jnp.float32) * 0.1
    wk_heads = jax.random.normal(keys[2], (n_heads, head_size, d_model), jnp.float32) * 0.1
    wv_heads = jax.random.normal(keys[3], (n_heads, head_size, d_model), jnp.float32) * 0.1
    wp = jax.random.normal(keys[4], (d_model, d_model), jnp.float32) * 0.1   # (D, D)
    bp = jax.random.normal(keys[5], (d_model,), jnp.float32) * 0.1           # (D,)

    # Pack weights for the kernel (one-time, host side).
    wq_p = jnp.transpose(wq_heads, (0, 2, 1)) * (head_size ** -0.5)  # (H, D, hs), scale folded
    wk_p = jnp.transpose(wk_heads, (0, 2, 1))                        # (H, D, hs)
    wv_p = jnp.transpose(wv_heads, (0, 2, 1))                        # (H, D, hs)
    wp_p = wp.T.reshape(n_heads, head_size, d_model)                 # (H, hs, D)
    bp_p = bp.reshape(1, d_model)                                    # (1, D)

    ref = mha_reference(x, wq_heads, wk_heads, wv_heads, wp, bp, head_size)

    # Production path: bf16 MXU operands, f32 accumulate / f32 softmax.
    out_bf16 = mha_forward(x, wq_p, wk_p, wv_p, wp_p, bp_p, compute_dtype=jnp.bfloat16)
    jax.block_until_ready(out_bf16)
    # f32 path for a tighter semantic check (only approx-reciprocal / assoc. drift).
    out_f32 = mha_forward(x, wq_p, wk_p, wv_p, wp_p, bp_p, compute_dtype=jnp.float32)
    jax.block_until_ready(out_f32)

    assert out_bf16.shape == (B, T, d_model)
    err_f32 = float(jnp.max(jnp.abs(out_f32 - ref)))
    err_bf16 = float(jnp.max(jnp.abs(out_bf16 - ref)))
    assert jnp.allclose(out_f32, ref, atol=5e-3, rtol=5e-3), err_f32
    assert jnp.allclose(out_bf16, ref, atol=3e-2, rtol=3e-2), err_bf16

    print("KERNEL_OK")
</pallas_src>

<mosaic_0001>
module attributes {stable_mosaic.version = 11 : i64} {
  func.func @_mha_flash_kernel(%arg0: i32, %arg1: i32, %arg2: i32, %arg3: i32, %arg4: memref<1x8x32xbf16, #tpu.memory_space<vmem>>, %arg5: memref<1x8x32xbf16, #tpu.memory_space<vmem>>, %arg6: memref<1x32x8xbf16, #tpu.memory_space<vmem>>, %arg7: memref<1x32x8xbf16, #tpu.memory_space<vmem>>, %arg8: memref<1x32x8xbf16, #tpu.memory_space<vmem>>, %arg9: memref<1x8x32xbf16, #tpu.memory_space<vmem>>, %arg10: memref<1x32xf32, #tpu.memory_space<vmem>>, %arg11: memref<1x8x32xf32, #tpu.memory_space<vmem>>, %arg12: memref<8x8xbf16, #tpu.memory_space<vmem>>, %arg13: memref<8x1xf32, #tpu.memory_space<vmem>>, %arg14: memref<8x1xf32, #tpu.memory_space<vmem>>, %arg15: memref<8x8xf32, #tpu.memory_space<vmem>>, %arg16: memref<8x32xf32, #tpu.memory_space<vmem>>) attributes {dimension_semantics = [#tpu.dimension_semantics<parallel>, #tpu.dimension_semantics<parallel>, #tpu.dimension_semantics<arbitrary>, #tpu.dimension_semantics<arbitrary>], iteration_bounds = array<i64: 2, 1, 4, 1>, scalar_prefetch = 0 : i64, scratch_operands = 5 : i64, tpu.core_type = #tpu.core_type<tc>, window_params = [{transform_indices = @transform_0, window_bounds = array<i64: 1, 8, 32>}, {transform_indices = @transform_1, window_bounds = array<i64: 1, 8, 32>}, {transform_indices = @transform_2, window_bounds = array<i64: 1, 32, 8>}, {transform_indices = @transform_3, window_bounds = array<i64: 1, 32, 8>}, {transform_indices = @transform_4, window_bounds = array<i64: 1, 32, 8>}, {transform_indices = @transform_5, window_bounds = array<i64: 1, 8, 32>}, {pipeline_mode = #tpu.pipeline_mode<synchronous>, transform_indices = @transform_6, window_bounds = array<i64: 1, 32>}, {transform_indices = @transform_7, window_bounds = array<i64: 1, 8, 32>}]} {
    %c0_i32 = arith.constant 0 : i32
    %0 = arith.cmpi eq, %arg2, %c0_i32 : i32
    %c0_i32_0 = arith.constant 0 : i32
    %1 = arith.cmpi eq, %arg3, %c0_i32_0 : i32
    %2 = arith.andi %0, %1 : i1
    %3 = arith.extui %2 : i1 to i32
    %c0_i32_1 = arith.constant 0 : i32
    %4 = arith.cmpi ne, %3, %c0_i32_1 : i32
    scf.if %4 {
      %cst = arith.constant 0.000000e+00 : f32
      %22 = vector.broadcast %cst : f32 to vector<8x32xf32>
      %c0 = arith.constant 0 : index
      %c0_10 = arith.constant 0 : index
      %23 = vector.load %arg16[%c0, %c0_10] : memref<8x32xf32, #tpu.memory_space<vmem>>, vector<8x32xf32>
      tpu.vector_store %arg16[%c0, %c0_10], %22 {strides = array<i32>} : memref<8x32xf32, #tpu.memory_space<vmem>>, vector<8x32xf32>,
    } else {
    }
    %c0_i32_2 = arith.constant 0 : i32
    %5 = arith.cmpi eq, %arg3, %c0_i32_2 : i32
    %6 = arith.extui %5 : i1 to i32
    %c0_i32_3 = arith.constant 0 : i32
    %7 = arith.cmpi ne, %6, %c0_i32_3 : i32
    scf.if %7 {
      %c0 = arith.constant 0 : index
      %c0_10 = arith.constant 0 : index
      %c0_11 = arith.constant 0 : index
      %22 = vector.load %arg4[%c0, %c0_10, %c0_11] : memref<1x8x32xbf16, #tpu.memory_space<vmem>>, vector<1x8x32xbf16>
      %23 = vector.shape_cast %22 : vector<1x8x32xbf16> to vector<8x32xbf16>
      %c0_12 = arith.constant 0 : index
      %c0_13 = arith.constant 0 : index
      %c0_14 = arith.constant 0 : index
      %24 = vector.load %arg6[%c0_12, %c0_13, %c0_14] : memref<1x32x8xbf16, #tpu.memory_space<vmem>>, vector<1x32x8xbf16>
      %25 = vector.shape_cast %24 : vector<1x32x8xbf16> to vector<32x8xbf16>
      %cst = arith.constant dense<0.000000e+00> : vector<8x8xf32>
      %26 = tpu.matmul %23, %25, %cst {dimension_numbers = #tpu.dot_dimension_numbers<[1], [0], [0], [1], [0, 0, 1, 1], [], []>} : vector<8x32xbf16>, vector<32x8xbf16>, vector<8x8xf32> -> vector<8x8xf32>
      %27 = arith.truncf %26 : vector<8x8xf32> to vector<8x8xbf16>
      %c0_15 = arith.constant 0 : index
      %c0_16 = arith.constant 0 : index
      %28 = vector.load %arg12[%c0_15, %c0_16] : memref<8x8xbf16, #tpu.memory_space<vmem>>, vector<8x8xbf16>
      tpu.vector_store %arg12[%c0_15, %c0_16], %27 {strides = array<i32>} : memref<8x8xbf16, #tpu.memory_space<vmem>>, vector<8x8xbf16>,
      %cst_17 = arith.constant 0xFF800000 : f32
      %29 = vector.broadcast %cst_17 : f32 to vector<8x1xf32>
      %c0_18 = arith.constant 0 : index
      %c0_19 = arith.constant 0 : index
      %30 = vector.load %arg13[%c0_18, %c0_19] : memref<8x1xf32, #tpu.memory_space<vmem>>, vector<8x1xf32>
      tpu.vector_store %arg13[%c0_18, %c0_19], %29 {strides = array<i32>} : memref<8x1xf32, #tpu.memory_space<vmem>>, vector<8x1xf32>,
      %cst_20 = arith.constant 0.000000e+00 : f32
      %31 = vector.broadcast %cst_20 : f32 to vector<8x1xf32>
      %c0_21 = arith.constant 0 : index
      %c0_22 = arith.constant 0 : index
      %32 = vector.load %arg14[%c0_21, %c0_22] : memref<8x1xf32, #tpu.memory_space<vmem>>, vector<8x1xf32>
      tpu.vector_store %arg14[%c0_21, %c0_22], %31 {strides = array<i32>} : memref<8x1xf32, #tpu.memory_space<vmem>>, vector<8x1xf32>,
      %cst_23 = arith.constant 0.000000e+00 : f32
      %33 = vector.broadcast %cst_23 : f32 to vector<8x8xf32>
      %c0_24 = arith.constant 0 : index
      %c0_25 = arith.constant 0 : index
      %34 = vector.load %arg15[%c0_24, %c0_25] : memref<8x8xf32, #tpu.memory_space<vmem>>, vector<8x8xf32>
      tpu.vector_store %arg15[%c0_24, %c0_25], %33 {strides = array<i32>} : memref<8x8xf32, #tpu.memory_space<vmem>>, vector<8x8xf32>,
    } else {
    }
    %c8_i32 = arith.constant 8 : i32
    %8 = arith.muli %arg1, %c8_i32 : i32
    %c8_i32_4 = arith.constant 8 : i32
    %9 = arith.muli %arg3, %c8_i32_4 : i32
    %c7_i32 = arith.constant 7 : i32
    %10 = arith.addi %8, %c7_i32 : i32
    %11 = arith.cmpi sge, %10, %9 : i32
    %12 = arith.extui %11 : i1 to i32
    %c0_i32_5 = arith.constant 0 : i32
    %13 = arith.cmpi ne, %12, %c0_i32_5 : i32
    scf.if %13 {
      %c0 = arith.constant 0 : index
      %c0_10 = arith.constant 0 : index
      %c0_11 = arith.constant 0 : index
      %22 = vector.load %arg5[%c0, %c0_10, %c0_11] : memref<1x8x32xbf16, #tpu.memory_space<vmem>>, vector<1x8x32xbf16>
      %23 = vector.shape_cast %22 : vector<1x8x32xbf16> to vector<8x32xbf16>
      %c0_12 = arith.constant 0 : index
      %c0_13 = arith.constant 0 : index
      %c0_14 = arith.constant 0 : index
      %24 = vector.load %arg7[%c0_12, %c0_13, %c0_14] : memref<1x32x8xbf16, #tpu.memory_space<vmem>>, vector<1x32x8xbf16>
      %25 = vector.shape_cast %24 : vector<1x32x8xbf16> to vector<32x8xbf16>
      %cst = arith.constant dense<0.000000e+00> : vector<8x8xf32>
      %26 = tpu.matmul %23, %25, %cst {dimension_numbers = #tpu.dot_dimension_numbers<[1], [0], [0], [1], [0, 0, 1, 1], [], []>} : vector<8x32xbf16>, vector<32x8xbf16>, vector<8x8xf32> -> vector<8x8xf32>
      %27 = arith.truncf %26 : vector<8x8xf32> to vector<8x8xbf16>
      %c0_15 = arith.constant 0 : index
      %c0_16 = arith.constant 0 : index
      %c0_17 = arith.constant 0 : index
      %28 = vector.load %arg8[%c0_15, %c0_16, %c0_17] : memref<1x32x8xbf16, #tpu.memory_space<vmem>>, vector<1x32x8xbf16>
      %29 = vector.shape_cast %28 : vector<1x32x8xbf16> to vector<32x8xbf16>
      %cst_18 = arith.constant dense<0.000000e+00> : vector<8x8xf32>
      %30 = tpu.matmul %23, %29, %cst_18 {dimension_numbers = #tpu.dot_dimension_numbers<[1], [0], [0], [1], [0, 0, 1, 1], [], []>} : vector<8x32xbf16>, vector<32x8xbf16>, vector<8x8xf32> -> vector<8x8xf32>
      %31 = arith.truncf %30 : vector<8x8xf32> to vector<8x8xbf16>
      %c0_19 = arith.constant 0 : index
      %c0_20 = arith.constant 0 : index
      %32 = vector.load %arg12[%c0_19, %c0_20] : memref<8x8xbf16, #tpu.memory_space<vmem>>, vector<8x8xbf16>
      %cst_21 = arith.constant dense<0.000000e+00> : vector<8x8xf32>
      %33 = tpu.matmul %32, %27, %cst_21 {dimension_numbers = #tpu.dot_dimension_numbers<[1], [1], [0], [0], [0, 0, 1, 0], [], []>} : vector<8x8xbf16>, vector<8x8xbf16>, vector<8x8xf32> -> vector<8x8xf32>
      %34 = tpu.iota {dimensions = array<i32: 0>} : vector<8x8xi32>
      %35 = vector.broadcast %8 : i32 to vector<8x8xi32>
      %36 = arith.addi %35, %34 : vector<8x8xi32>
      %37 = tpu.iota {dimensions = array<i32: 1>} : vector<8x8xi32>
      %38 = vector.broadcast %9 : i32 to vector<8x8xi32>
      %39 = arith.addi %38, %37 : vector<8x8xi32>
      %40 = arith.cmpi sge, %36, %39 : vector<8x8xi32>
      %cst_22 = arith.constant -1.000000e+30 : f32
      %41 = vector.broadcast %cst_22 : f32 to vector<8x8xf32>
      %42 = arith.select %40, %33, %41 : vector<8x8xi1>, vector<8x8xf32>
      %c0_23 = arith.constant 0 : index
      %c0_24 = arith.constant 0 : index
      %43 = vector.load %arg13[%c0_23, %c0_24] : memref<8x1xf32, #tpu.memory_space<vmem>>, vector<8x1xf32>
      %cst_25 = arith.constant dense<0xFF800000> : vector<8xf32>
      %44 = vector.multi_reduction <maximumf>, %42, %cst_25 [1] : vector<8x8xf32> to vector<8xf32>
      %45 = vector.shape_cast %44 : vector<8xf32> to vector<8x1xf32>
      %46 = arith.maximumf %43, %45 : vector<8x1xf32>
      %47 = arith.subf %43, %46 : vector<8x1xf32>
      %48 = math.exp %47 : vector<8x1xf32>
      %49 = vector.broadcast %46 : vector<8x1xf32> to vector<8x8xf32>
      %50 = arith.subf %42, %49 : vector<8x8xf32>
      %51 = math.exp %50 : vector<8x8xf32>
      %c0_26 = arith.constant 0 : index
      %c0_27 = arith.constant 0 : index
      %52 = vector.load %arg14[%c0_26, %c0_27] : memref<8x1xf32, #tpu.memory_space<vmem>>, vector<8x1xf32>
      %53 = arith.mulf %48, %52 : vector<8x1xf32>
      %cst_28 = arith.constant dense<0.000000e+00> : vector<8xf32>
      %54 = vector.multi_reduction <add>, %51, %cst_28 [1] : vector<8x8xf32> to vector<8xf32>
      %55 = vector.shape_cast %54 : vector<8xf32> to vector<8x1xf32>
      %56 = arith.addf %53, %55 : vector<8x1xf32>
      %c0_29 = arith.constant 0 : index
      %c0_30 = arith.constant 0 : index
      %57 = vector.load %arg14[%c0_29, %c0_30] : memref<8x1xf32, #tpu.memory_space<vmem>>, vector<8x1xf32>
      tpu.vector_store %arg14[%c0_29, %c0_30], %56 {strides = array<i32>} : memref<8x1xf32, #tpu.memory_space<vmem>>, vector<8x1xf32>,
      %c0_31 = arith.constant 0 : index
      %c0_32 = arith.constant 0 : index
      %58 = vector.load %arg15[%c0_31, %c0_32] : memref<8x8xf32, #tpu.memory_space<vmem>>, vector<8x8xf32>
      %59 = vector.broadcast %48 : vector<8x1xf32> to vector<8x8xf32>
      %60 = arith.mulf %59, %58 : vector<8x8xf32>
      %61 = arith.truncf %51 : vector<8x8xf32> to vector<8x8xbf16>
      %cst_33 = arith.constant dense<0.000000e+00> : vector<8x8xf32>
      %62 = tpu.matmul %61, %31, %cst_33 {dimension_numbers = #tpu.dot_dimension_numbers<[1], [0], [0], [1], [0, 0, 1, 1], [], []>} : vector<8x8xbf16>, vector<8x8xbf16>, vector<8x8xf32> -> vector<8x8xf32>
      %63 = arith.addf %60, %62 : vector<8x8xf32>
      %c0_34 = arith.constant 0 : index
      %c0_35 = arith.constant 0 : index
      %64 = vector.load %arg15[%c0_34, %c0_35] : memref<8x8xf32, #tpu.memory_space<vmem>>, vector<8x8xf32>
      tpu.vector_store %arg15[%c0_34, %c0_35], %63 {strides = array<i32>} : memref<8x8xf32, #tpu.memory_space<vmem>>, vector<8x8xf32>,
      %c0_36 = arith.constant 0 : index
      %c0_37 = arith.constant 0 : index
      %65 = vector.load %arg13[%c0_36, %c0_37] : memref<8x1xf32, #tpu.memory_space<vmem>>, vector<8x1xf32>
      tpu.vector_store %arg13[%c0_36, %c0_37], %46 {strides = array<i32>} : memref<8x1xf32, #tpu.memory_space<vmem>>, vector<8x1xf32>,
    } else {
    }
    %c0_i32_6 = arith.constant 0 : i32
    %14 = arith.cmpi eq, %arg3, %c0_i32_6 : i32
    %15 = arith.extui %14 : i1 to i32
    %c0_i32_7 = arith.constant 0 : i32
    %16 = arith.cmpi ne, %15, %c0_i32_7 : i32
    scf.if %16 {
      %c0 = arith.constant 0 : index
      %c0_10 = arith.constant 0 : index
      %22 = vector.load %arg15[%c0, %c0_10] : memref<8x8xf32, #tpu.memory_space<vmem>>, vector<8x8xf32>
      %c0_11 = arith.constant 0 : index
      %c0_12 = arith.constant 0 : index
      %23 = vector.load %arg14[%c0_11, %c0_12] : memref<8x1xf32, #tpu.memory_space<vmem>>, vector<8x1xf32>
      %24 = tpu.reciprocal %23 {approx = true} : vector<8x1xf32> -> vector<8x1xf32>
      %25 = vector.broadcast %24 : vector<8x1xf32> to vector<8x8xf32>
      %26 = arith.mulf %22, %25 : vector<8x8xf32>
      %c0_13 = arith.constant 0 : index
      %c0_14 = arith.constant 0 : index
      %27 = vector.load %arg16[%c0_13, %c0_14] : memref<8x32xf32, #tpu.memory_space<vmem>>, vector<8x32xf32>
      %28 = arith.truncf %26 : vector<8x8xf32> to vector<8x8xbf16>
      %c0_15 = arith.constant 0 : index
      %c0_16 = arith.constant 0 : index
      %c0_17 = arith.constant 0 : index
      %29 = vector.load %arg9[%c0_15, %c0_16, %c0_17] : memref<1x8x32xbf16, #tpu.memory_space<vmem>>, vector<1x8x32xbf16>
      %30 = vector.shape_cast %29 : vector<1x8x32xbf16> to vector<8x32xbf16>
      %cst = arith.constant dense<0.000000e+00> : vector<8x32xf32>
      %31 = tpu.matmul %28, %30, %cst {dimension_numbers = #tpu.dot_dimension_numbers<[1], [0], [0], [1], [0, 0, 1, 1], [], []>} : vector<8x8xbf16>, vector<8x32xbf16>, vector<8x32xf32> -> vector<8x32xf32>
      %32 = arith.addf %27, %31 : vector<8x32xf32>
      %c0_18 = arith.constant 0 : index
      %c0_19 = arith.constant 0 : index
      %33 = vector.load %arg16[%c0_18, %c0_19] : memref<8x32xf32, #tpu.memory_space<vmem>>, vector<8x32xf32>
      tpu.vector_store %arg16[%c0_18, %c0_19], %32 {strides = array<i32>} : memref<8x32xf32, #tpu.memory_space<vmem>>, vector<8x32xf32>,
    } else {
    }
    %c3_i32 = arith.constant 3 : i32
    %17 = arith.cmpi eq, %arg2, %c3_i32 : i32
    %c0_i32_8 = arith.constant 0 : i32
    %18 = arith.cmpi eq, %arg3, %c0_i32_8 : i32
    %19 = arith.andi %17, %18 : i1
    %20 = arith.extui %19 : i1 to i32
    %c0_i32_9 = arith.constant 0 : i32
    %21 = arith.cmpi ne, %20, %c0_i32_9 : i32
    scf.if %21 {
      %c0 = arith.constant 0 : index
      %c0_10 = arith.constant 0 : index
      %22 = vector.load %arg16[%c0, %c0_10] : memref<8x32xf32, #tpu.memory_space<vmem>>, vector<8x32xf32>
      %c0_11 = arith.constant 0 : index
      %c0_12 = arith.constant 0 : index
      %23 = vector.load %arg10[%c0_11, %c0_12] : memref<1x32xf32, #tpu.memory_space<vmem>>, vector<1x32xf32>
      %24 = vector.broadcast %23 : vector<1x32xf32> to vector<8x32xf32>
      %25 = arith.addf %22, %24 : vector<8x32xf32>
      %c0_13 = arith.constant 0 : index
      %c0_14 = arith.constant 0 : index
      %c0_15 = arith.constant 0 : index
      %26 = vector.load %arg11[%c0_13, %c0_14, %c0_15] : memref<1x8x32xf32, #tpu.memory_space<vmem>>, vector<1x8x32xf32>
      %27 = vector.shape_cast %26 : vector<1x8x32xf32> to vector<8x32xf32>
      %28 = vector.shape_cast %25 : vector<8x32xf32> to vector<1x8x32xf32>
      tpu.vector_store %arg11[%c0_13, %c0_14, %c0_15], %28 {strides = array<i32>} : memref<1x8x32xf32, #tpu.memory_space<vmem>>, vector<1x8x32xf32>,
    } else {
    }
    return
  }
  func.func @transform_0(%arg0: i32, %arg1: i32, %arg2: i32, %arg3: i32) -> (i32, i32, i32) {
    %c0_i32 = arith.constant 0 : i32
    %c0_i32_0 = arith.constant 0 : i32
    return %arg0, %arg1, %c0_i32 : i32, i32, i32
  }
  func.func @transform_1(%arg0: i32, %arg1: i32, %arg2: i32, %arg3: i32) -> (i32, i32, i32) {
    %c0_i32 = arith.constant 0 : i32
    %c0_i32_0 = arith.constant 0 : i32
    return %arg0, %arg3, %c0_i32 : i32, i32, i32
  }
  func.func @transform_2(%arg0: i32, %arg1: i32, %arg2: i32, %arg3: i32) -> (i32, i32, i32) {
    %c0_i32 = arith.constant 0 : i32
    %c0_i32_0 = arith.constant 0 : i32
    %c0_i32_1 = arith.constant 0 : i32
    return %arg2, %c0_i32, %c0_i32_0 : i32, i32, i32
  }
  func.func @transform_3(%arg0: i32, %arg1: i32, %arg2: i32, %arg3: i32) -> (i32, i32, i32) {
    %c0_i32 = arith.constant 0 : i32
    %c0_i32_0 = arith.constant 0 : i32
    %c0_i32_1 = arith.constant 0 : i32
    return %arg2, %c0_i32, %c0_i32_0 : i32, i32, i32
  }
  func.func @transform_4(%arg0: i32, %arg1: i32, %arg2: i32, %arg3: i32) -> (i32, i32, i32) {
    %c0_i32 = arith.constant 0 : i32
    %c0_i32_0 = arith.constant 0 : i32
    %c0_i32_1 = arith.constant 0 : i32
    return %arg2, %c0_i32, %c0_i32_0 : i32, i32, i32
  }
  func.func @transform_5(%arg0: i32, %arg1: i32, %arg2: i32, %arg3: i32) -> (i32, i32, i32) {
    %c0_i32 = arith.constant 0 : i32
    %c0_i32_0 = arith.constant 0 : i32
    %c0_i32_1 = arith.constant 0 : i32
    return %arg2, %c0_i32, %c0_i32_0 : i32, i32, i32
  }
  func.func @transform_6(%arg0: i32, %arg1: i32, %arg2: i32, %arg3: i32) -> (i32, i32) {
    %c0_i32 = arith.constant 0 : i32
    %c0_i32_0 = arith.constant 0 : i32
    %c0_i32_1 = arith.constant 0 : i32
    return %c0_i32, %c0_i32_0 : i32, i32
  }
  func.func @transform_7(%arg0: i32, %arg1: i32, %arg2: i32, %arg3: i32) -> (i32, i32, i32) {
    %c0_i32 = arith.constant 0 : i32
    %c0_i32_0 = arith.constant 0 : i32
    return %arg0, %arg1, %c0_i32 : i32, i32, i32
  }
}

</mosaic_0001>

<bundles_post_ra>
// kernel: mha_forward.1
= control target key start
LH: loop header
LB: loop body
LE: loop exit
PB: predicated region body
PF: predicated region fallthrough
CT: control target
= control target key end

     0   :  { %s1527_s0 = inlined_call_operand.vmem [shape: bf16[2,8,32], index: 0, kind: input, shape index: {}, may-alias: {0,1}]   ;;  %s1528_s1 = inlined_call_operand.vmem [shape: bf16[2,8,32], index: 1, kind: input, shape index: {}, may-alias: {0,1}]   ;;  %s1529_s2 = inlined_call_operand.vmem [shape: bf16[4,32,8], index: 2, kind: input, shape index: {}]   ;;  %s1530_s3 = inlined_call_operand.vmem [shape: bf16[4,32,8], index: 3, kind: input, shape index: {}]   ;;  %s1531_s4 = inlined_call_operand.vmem [shape: bf16[4,32,8], index: 4, kind: input, shape index: {}]   ;;  %s1532_s5 = inlined_call_operand.vmem [shape: bf16[4,8,32], index: 5, kind: input, shape index: {}]   ;;  %s1533_s6 = inlined_call_operand.vmem [shape: f32[1,32], index: 6, kind: input, shape index: {}]   ;;  %s1534_s7 = inlined_call_operand.hbm [shape: f32[2,8,32], index: 7, kind: output, shape index: {}]  }
   0x1   :  { %1544 = sst [smem:[#allocation19_spill]] %s1527_s0 }
   0x2   :  { %12 = vsyncpa [#allocation8], 0 }
   0x3   :  { %14 = vsyncpa [#allocation8 + $0x1], 0  ;;  %s1333_s24 = smov 0   ;;  %s1335_s25 = smov 0  }
   0x4   :  { %s1337_s26 = smov 0   ;;  %s1339_s27 = smov 0  }
   0x5   :  { %s1341_s28 = smov 0   ;;  %s1343_s29 = smov 0  }
   0x6   :  { %s1345_s30 = smov 0   ;;  %s1347_s8 = smov 0  }
   0x7 LB: > { %1545 = sst [smem:[#allocation10_spill]] %s1257_s24  ;;  %s1005_s9 = sadd.s32 4294967295, %s1285_s8   ;;  %s1285_s8 = sphi %s1347_s8, %s20_s8   ;;  %s1281_s30 = sphi %s1345_s30, %s1566_s30   ;;  %s1277_s29 = sphi %s1343_s29, %s1565_s29   ;;  %s1273_s28 = sphi %s1341_s28, %s1564_s28   ;;  %s1269_s27 = sphi %s1339_s27, %s1570_s27   ;;  %s1265_s26 = sphi %s1337_s26, %s1569_s26   ;;  %s1261_s25 = sphi %s1335_s25, %s1568_s25   ;;  %s1257_s24 = sphi %s1333_s24, %s1567_s24  }
   0x8   : > { %1546 = sst [smem:[#allocation11_spill]] %s1265_s26  ;;  %s1006_s10 = sadd.s32 4294967294, %s1285_s8  }
   0x9   : > { %1547 = sst [smem:[#allocation12_spill]] %s1277_s29  ;;  %s38_s11 = sadd.s32 1, %s1277_s29 }
   0xa   : > { %1548 = sst [smem:[#allocation13_spill]] %s1281_s30  ;;  %p40_p0 = scmp.ge.s32.totalorder %s38_s11, 4 }
   0xb   : > { %1549 = sst [smem:[#allocation14_spill]] %s1285_s8  ;;  %s46_s12 = sadd.s32 1, %s1281_s30 }
   0xc   : > { %p246_p1 = scmp.ne.s32.totalorder %s1265_s26, %s1261_s25  ;;  %p247_p2 = scmp.eq.s32.totalorder %s1005_s9, 7 }
   0xd   : > { %s1572_s11 = smov (%p40_p0, %s38_s11), 0  ;;  %s1574_s12 = smov (!%p40_p0, %s46_s12), %s1281_s30 }
   0xe   : > { %1550 = sst [smem:[#allocation15_spill]] %s1572_s11  ;;  %p1382_p3 = por %p247_p2, %p246_p1 }
   0xf   : > { %p252_p4 = scmp.ne.s32.totalorder %s1261_s25, %s1257_s24  ;;  %p48_p5 = scmp.ge.s32.totalorder %s1574_s12, 2 }
  0x10   : > { %p253_p6 = scmp.eq.s32.totalorder %s1006_s10, 7  ;;  %p1009_p7 = scmp.ge.s32.totalorder %s1285_s8, 1 }
  0x11   : > { %p325_p8 = scmp.lt.s32.totalorder %s1285_s8, 9  ;;  %s1576_s12 = smov (%p48_p5, %s1574_s12), 0 }
  0x12   : > { %1552 = sst [smem:[#allocation16_spill]] %s1576_s12  ;;  %p1392_p9 = por %p253_p6, %p252_p4 }
  0x13   : > { %p326_p10 = pnand %p1009_p7, %p325_p8  ;;  %s231_s15 = ssub.s32 %s1281_s30, %s1576_s12 }
  0x14   : > { %s1553_s14 = scalar_select %p1392_p9, 1, 0 }
  0x15   : > { %s236_s16 = sadd.s32 1, %s1265_s26  ;;  %p234_p11 = scmp.eq.s32.totalorder %s231_s15, 0 }
  0x16   : > { %1554 = sst [smem:[#allocation17_spill]] %s1553_s14  ;;  %329 = sbr.rel (%p326_p10) target bundleno = 1317 (0x525), region = 48 }
  0x17   : > { %s1400_s17 = scalar_select %p234_p11, %s1265_s26, %s236_s16  }
  0x18   : > { %s1538_s18 = sand.u32 (!%p326_p10), 1, %s1261_s25   ;;  %p385_p12 = scmp.lt.s32.totalorder (!%p326_p10), %s1273_s28, 1 }
  0x19   : > { %1555 = sst [smem:[#allocation18_spill]] %s1400_s17  ;;  %s1406_s19 = sshll.u32 (!%p326_p10), %s1538_s18, 3 }
  0x1a   : > { %p399_p13 = scmp.lt.s32.totalorder (!%p326_p10), %s1269_s27, 3  ;;  %p419_p0 = scmp.eq.s32.totalorder (!%p326_p10), %s1269_s27, 0 }
  0x1b   : > { %s1556_s0 = sld [smem:[#allocation19_spill]] (!%p326_p10)  ;;  %s384_s15 = scalar_lea.vmem (!%p326_p10), [#allocation7], %s1406_s19 }
  0x1d   : > { %s386_s20 = scalar_select %p385_p12, %s1273_s28, 1 }
  0x1e   : > { %s400_s21 = scalar_select %p399_p13, %s1269_s27, 3 }
  0x1f   : > { %s1011_s22 = sshll.u32 %s386_s20, 2  ;;  %424 = sbr.rel (!%p419_p0) target bundleno = 38 (0x26), region = 52  ;;  %vm425_vm0 = vcmask (%p419_p0), 261120   ;;  %v1287_v0 = vmov (%p419_p0), 0.0  }
  0x20   : > { %s1418_s12 = scalar_lea.vmem %s1528_s1, %s1011_s22  ;;  %s1039_s11 = sshll.u32 %s400_s21, 4  ;;  %426 = vst.msk [vmem:[#allocation6] sm:$0xff] (%p419_p0), %vm425_vm0, %v1287_v0 }
  0x21   : > { %s391_s10 = scalar_lea.vmem %s1556_s0, %s1011_s22  ;;  %s1019_s30 = sshll.u32 %s400_s21, 2 }
  0x22   : > { %s403_s17 = scalar_lea.vmem %s1529_s2, %s1039_s11  ;;  %s408_s24 = scalar_lea.vmem %s1530_s3, %s1039_s11 }
  0x23   : > { %s1429_s23 = scalar_lea.vmem %s1531_s4, %s1039_s11  ;;  %s1434_s22 = scalar_lea.vmem %s1532_s5, %s1019_s30 }
  0x26 PF: > { %v1179_v1 = vld [vmem:[%s403_s17] sm:$0xff]   ;;  %v1288_v2 = vmov 0.0   ;;  %v1181_v4 = vld [vmem:[%s403_s17 + $0x8] sm:$0xff]   ;;  %vm1289_vm1 = vmmov 0   ;;  %vm447_vm2 = vcmask 261120   ;;  %vm497_vm3 = vcmask 64512  }
  0x27   : > { %1059 = vmatprep.subr.bf16.mxu0 %v1288_v2  ;;  %1067 = vmatprep.subr.bf16.mxu1 %v1288_v2  ;;  %v1180_v3 = vld [vmem:[%s408_s24] sm:$0xff]   ;;  %v1182_v5 = vld [vmem:[%s408_s24 + $0x8] sm:$0xff]   ;;  %498 = vst.msk [vmem:[#allocation5] sm:$0xff] %vm497_vm3, %v1288_v2  ;;  %vm492_vm4 = vcmask 60416   ;;  %vm494_vm5 = vcmask 7168   ;;  %v1290_v21 = vmov -inf   ;;  %v673_v23 = vlaneseq }
  0x28   : > { %1060 = vmatpush3.bf16.msra.mxu0 %v1179_v1  ;;  %1063 = vmatprep.mubr.msk.bf16.mxu0 %vm1289_vm1, %v1288_v2  ;;  %v430_v6 = vld [vmem:[%s391_s10] sm:$0xf]  ;;  %495 = vst.msk [vmem:[#allocation3] sm:$0xff] %vm494_vm5, %v1290_v21  ;;  %496 = vst.msk [vmem:[#allocation4] sm:$0xff] %vm494_vm5, %v1288_v2  ;;  %v1184_v22 = vld [vmem:[%s1429_s23 + $0x8] sm:$0xff]   ;;  %v1291_v32 = vmov 0  }
  0x29   : > { %1068 = vmatpush3.bf16.msra.mxu1 %v1180_v3  ;;  %1061 = vmatprep.subr.bf16.mxu0 %v1288_v2  ;;  %v506_v7 = vld [vmem:[%s1418_s12] sm:$0xf]  ;;  %v674_v24 = vshrl.u32 %v673_v23, 7  ;;  %v678_v25 = vand.u32 127, %v673_v23  ;;  %vm718_vm7 = vcmask 1043456   ;;  %p831_p1 = scmp.eq.s32.totalorder %s1269_s27, 3 }
  0x2a   : > { %1069 = vmatprep.subr.bf16.mxu1 %v1288_v2  ;;  %1071 = vmatprep.mubr.msk.bf16.mxu1 %vm1289_vm1, %v1288_v2  ;;  %v1183_v20 = vld [vmem:[%s1429_s23] sm:$0xff]  }
  0x2b   : > { %vm681_vm6 = vcmp.ge.s32.totalorder %v674_v24, %v678_v25  ;;  %1177 = vset.pattern.permute.xlu0 %v1291_v32  ;;  %1178 = vset.pattern.permute.xlu1 %v1291_v32  ;;  %v779_v51 = vld [vmem:[%s1434_s22] sm:$0xf] }
  0x2c   : > { %1062 = vmatpush3.bf16.msra.mxu0 %v1181_v4  ;;  %v786_v52 = vsel %vm718_vm7, %v779_v51, 0 }
  0x2d   : > { %1070 = vmatpush3.bf16.msra.mxu1 %v1182_v5  ;;  %1075 = vmatprep.subr.bf16.mxu0 %v1288_v2 }
  0x2e   : > { %1083 = vmatprep.subr.bf16.mxu1 %v1288_v2  ;;  %v707_v59 = vld [vmem:[#allocation5] sm:$0xff] }
  0x2f   : > { %1064 = vmatmul.mubr.msk.bf16.vlgmr.msra.gmra.mrb[0].mxu0 %vm447_vm2, %v430_v6  ;;  %v683_v33 = vld [vmem:[#allocation3] sm:$0xff]  ;;  %v699_v53 = vld [vmem:[#allocation4] sm:$0xff] }
  0x30   : > { %1072 = vmatmul.mubr.msk.bf16.vlgmr.msra.gmra.mrb[0].mxu1 %vm447_vm2, %v506_v7  ;;  %1079 = vmatprep.mubr.msk.bf16.mxu0 %vm1289_vm1, %v1288_v2 }
  0x31   : > { %1085 = vmatprep.mubr.msk.bf16.mxu1 %vm1289_vm1, %v1288_v2  ;;  %1076 = vmatpush3.bf16.msra.mxu0 %v1183_v20 }
  0x32   : > { %1077 = vmatprep.subr.bf16.mxu0 %v1288_v2 }
  0x35   : > { %1078 = vmatpush3.bf16.msra.mxu0 %v1184_v22 }
  0x36   : > { %1089 = vmatprep.subr.bf16.mxu0 %v1288_v2 }
  0x38   : > { %1080 = vmatmul.mubr.msk.bf16.vlgmr.msra.gmra.mrb[4].mxu0 %vm447_vm2, %v506_v7  ;;  %v777_v7 = vld [vmem:[#allocation6] sm:$0xff] }
  0x39   : > { %1091 = vmatprep.mubr.msk.bf16.mxu0 %vm1289_vm1, %v1288_v2 }
 0x102   : > { %v485_v8 = vpop.f32.mrb[0].mxu0 }
 0x103   : > { %v491_v9 = vpack.c.bf16 %v485_v8, %v485_v8  ;;  %v561_v10 = vpop.f32.mrb[0].mxu1  ;;  %v1065_v11 = vpop.f32.mrb[1].mxu0 }
 0x104   : > { %v567_v12 = vpack.c.bf16 %v561_v10, %v561_v10  ;;  %v1073_v13 = vpop.f32.mrb[1].mxu1  ;;  %v488_v14 = vpop.f32.mrb[2].mxu0 }
 0x105   : > { %493 = vst.msk [vmem:[#allocation2] sm:$0xf] %vm492_vm4, %v491_v9  ;;  %v564_v15 = vpop.f32.mrb[2].mxu1  ;;  %v1066_v16 = vpop.f32.mrb[3].mxu0  ;;  %v1034_v14 = vld [vmem:[%s1533_s6] ss:$0 sm:$0xff] (%p831_p1) }
 0x106   : > { %v631_v17 = vsel %vm497_vm3, %v567_v12, 0  ;;  %v1074_v18 = vpop.f32.mrb[3].mxu1 }
 0x107   : > { %1084 = vmatpush3.bf16.xpose.msra.mxu1 %v631_v17 }
 0x108   : > { %1095 = vmatprep.subr.bf16.mxu1 %v1288_v2 }
 0x10b   : > { %v618_v37 = vpop.f32.mrb[4].mxu0 }
 0x10c   : > { %v625_v19 = vld [vmem:[#allocation2] sm:$0xf]  ;;  %v624_v38 = vpack.c.bf16 %v618_v37, %v618_v37  ;;  %v1081_v39 = vpop.f32.mrb[5].mxu0 }
 0x10d   : > { %v621_v40 = vpop.f32.mrb[6].mxu0 }
 0x10e   : > { %1086 = vmatmul.mubr.msk.bf16.vlgmr.msra.gmra.mrb[4].mxu1 %vm497_vm3, %v625_v19  ;;  %v720_v41 = vsel %vm718_vm7, %v624_v38, 0  ;;  %v1082_v42 = vpop.f32.mrb[7].mxu0 }
 0x10f   : > { %1097 = vmatprep.mubr.msk.bf16.mxu1 %vm1289_vm1, %v1288_v2  ;;  %1090 = vmatpush3.bf16.msra.mxu0 %v720_v41 }
 0x110   : > { %1096 = vmatpush3.bf16.msra.mxu1 %v786_v52 }
 0x1e1   : > { %v667_v26 = vpop.f32.mrb[4].mxu1 }
 0x1e2   : > { %v682_v27 = vsel %vm681_vm6, %v667_v26, -1e+30  ;;  %v1087_v28 = vpop.f32.mrb[5].mxu1 }
 0x1e3   : > { %v670_v29 = vpop.f32.mrb[6].mxu1  ;;  %v684_v30 = vsel %vm497_vm3, %v682_v27, -inf }
 0x1e4   : > { %685 = vmax.xlane.f32.xlu0 %v684_v30  ;;  %v1088_v31 = vpop.f32.mrb[7].mxu1 }
 0x271   : > { %v686_v34 = vpop.xlane.xlu0 %685 }
 0x272   : > { %v687_v35 = vmax.f32 %v683_v33, %v686_v34 }
 0x274   : > { %v688_v36 = vsub.f32 %v683_v33, %v687_v35  ;;  %764 = vst.msk [vmem:[#allocation3] sm:$0xff] %vm494_vm5, %v687_v35  ;;  %693 = vperm.xlu0 %1177, %v687_v35  }
 0x276   : > { %v689_v49 = vmul.f32 1.442695, %v688_v36 }
 0x2f3   : > { %v694_v43 = vpop.permute.xlu0 %693 }
 0x2f4   : > { %v696_v44 = vsub.f32 %v682_v27, %v694_v43 }
 0x2f6   : > { %v697_v45 = vmul.f32 1.442695, %v696_v44 }
 0x2f8   : > { %1185 = vpow2.f32 %v697_v45 }
 0x2f9   : > { %1187 = vpow2.f32 %v689_v49 }
 0x302   : > { %v1186_v46 = vpop.eup %1185 }
 0x303   : > { %v701_v47 = vsel %vm497_vm3, %v1186_v46, 0.0  ;;  %v714_v48 = vpack.c.bf16 %v1186_v46, %v1186_v46  ;;  %v1188_v50 = vpop.eup %1187 }
 0x304   : > { %702 = vadd.xlane.f32.xlu1 %v701_v47  ;;  %v700_v54 = vmul.f32 %v1188_v50, %v699_v53 }
 0x305   : > { %1092 = vmatmul.mubr.msk.bf16.vlgmr.msra.gmra.mrb[8].mxu0 %vm497_vm3, %v714_v48 }
 0x315   : > { %710 = vperm.xlu1 %1178, %v1188_v50  }
 0x391   : > { %v703_v55 = vpop.xlane.xlu1 %702 }
 0x392   : > { %v704_v56 = vadd.f32 %v703_v55, %v700_v54 }
 0x394   : > { %706 = vst.msk [vmem:[#allocation4] sm:$0xff] %vm494_vm5, %v704_v56 }
 0x395   : > { %v711_v60 = vpop.permute.xlu1 %710 }
 0x396   : > { %v713_v61 = vmul.f32 %v711_v60, %v707_v59 }
 0x39b   : > { %v769_v57 = vld [vmem:[#allocation4] sm:$0xff] }
 0x39c   : > { %1189 = vrcp.f32 %v769_v57 }
 0x3a6   : > { %v1190_v58 = vpop.eup %1189 }
 0x3a7   : > { %773 = vperm.xlu1 %1178, %v1190_v58  }
 0x3d8   : > { %v756_v62 = vpop.f32.mrb[8].mxu0 }
 0x3d9   : > { %v762_v63 = vadd.f32 %v756_v62, %v713_v61  ;;  %v1093_v0 = vpop.f32.mrb[9].mxu0 }
 0x3da   : > { %v759_v1 = vpop.f32.mrb[10].mxu0 }
 0x3db   : > { %763 = vst.msk [vmem:[#allocation5] sm:$0xff] %vm497_vm3, %v762_v63  ;;  %v1094_v2 = vpop.f32.mrb[11].mxu0 }
 0x3e2   : > { %v768_v4 = vld [vmem:[#allocation5] sm:$0xff] }
 0x426   : > { %v774_v3 = vpop.permute.xlu1 %773 }
 0x427   : > { %v776_v5 = vmul.f32 %v774_v3, %v768_v4 }
 0x429   : > { %v778_v6 = vpack.c.bf16 %v776_v5, %v776_v5 }
 0x42b   : > { %1098 = vmatmul.mubr.msk.bf16.vlgmr.msra.gmra.mrb[8].mxu1 %vm497_vm3, %v778_v6 }
 0x4fb   : > { %835 = sbr.rel (!%p831_p1) target bundleno = 1292 (0x50c), region = 68 }
 0x4fe   : > { %v822_v8 = vpop.f32.mrb[8].mxu1 }
 0x4ff   : > { %v828_v9 = vadd.f32 %v822_v8, %v777_v7  ;;  %v1099_v10 = vpop.f32.mrb[9].mxu1 }
 0x500   : > { %v825_v11 = vpop.f32.mrb[10].mxu1 }
 0x501   : > { %830 = vst.msk [vmem:[#allocation6] sm:$0xff] %vm447_vm2, %v828_v9  ;;  %v1100_v12 = vpop.f32.mrb[11].mxu1 }
 0x508   : > { %v836_v13 = vld [vmem:[#allocation6] sm:$0xff] }
 0x509   : > { %v844_v15 = vadd.f32 %v1034_v14, %v836_v13 }
 0x50b   : > { %846 = vst.msk [vmem:[%s384_s15] sm:$0xff] %vm447_vm2, %v844_v15 }
 0x50c PF: > { %s1036_s26 = sshll.u32 %s1273_s28, 7  ;;  %s862_s8 = sshll.u32 %s384_s15, 4  ;;  %s863_s8 = int_to_ptr.vmem [resolvable:$true] %s862_s8 }
 0x50d   : > { %s1476_s30 = scalar_lea.hbm %s1534_s7, %s1036_s26  ;;  %s1557_s11 = sand.u32 1, %s1261_s25  }
 0x50e   : > { %s848_s12 = scalar_lea.sflag [#allocation8], %s1557_s11  ;;  %s1191_s14 = scalar_lea.vmem %s863_s8, 128 }
 0x50f   : > { %p1192_p2 = scmp.ne.s32.totalorder %s863_s8, %s1191_s14  ;;  %s1292_s17 = smov [#allocation7]  }
 0x510   : > { %s1195_s18 = sshll.u32 %s1292_s17, 4  ;;  %s1196_s18 = int_to_ptr.vmem [resolvable:$false] %s1195_s18 }
 0x511   : > { %p1193_p4 = pnand %p1192_p2, %p1382_p3  ;;  %s1197_s21 = scalar_lea.vmem %s1196_s18, 256 }
 0x512   : > { %p1198_p6 = scmp.lt.s32.totalorder %s863_s8, %s1196_s18  ;;  %p1199_p7 = scmp.lt.s32.totalorder %s1197_s21, %s1191_s14 }
 0x513   : > { %p1194_p5 = pneg %p1193_p4 }
 0x514   : > { %p1200_p8 = por %p1199_p7, %p1198_p6 }
 0x516   : > { %p1201_p10 = pnand %p1200_p8, %p1194_p5 }
 0x518   : > { %1204 = shalt.err (!%p1201_p10)
}
 0x519   : > { %s1205_s28 = scalar_lea.hbm %s1476_s30, 128  ;;  %s1209_s16 = scalar_lea.hbm %s1534_s7, 256 }
 0x51a   : > { %p1206_p11 = scmp.ne.s32.totalorder %s1476_s30, %s1205_s28  ;;  %p1210_p0 = scmp.lt.u32.totalorder %s1476_s30, %s1534_s7 }
 0x51b   : > { %p1211_p1 = scmp.lt.u32.totalorder %s1209_s16, %s1205_s28  ;;  %p1213_p4 = scmp.lt.u32.totalorder %s1205_s28, %s1476_s30 }
 0x51c   : > { %p1207_p12 = pnand %p1206_p11, %p1382_p3 }
 0x51d   : > { %p1212_p2 = por %p1211_p1, %p1210_p0 }
 0x51e   : > { %p1208_p13 = pneg %p1207_p12 }
 0x51f   : > { %p1214_p5 = por %p1213_p4, %p1212_p2 }
 0x521   : > { %p1215_p6 = pnand %p1214_p5, %p1208_p13 }
 0x523   : > { %1218 = shalt.err (!%p1215_p6)
}
 0x524   : > { %1101 = dma.vmem_to_hbm [thread:$0]  (%p1382_p3), %s863_s8, 128, %s1476_s30, %s848_s12  }
 0x525 PF: > { %s1558_s9 = sld [smem:[#allocation14_spill]]  ;;  %s1559_s22 = sld [smem:[#allocation10_spill]] }
 0x52b   : > { %p1107_p7 = scmp.ge.s32.totalorder %s1558_s9, 2  ;;  %s874_s0 = sand.u32 1, %s1559_s22  }
 0x52c   : > { %s875_s24 = scalar_lea.sflag [#allocation8], %s874_s0 }
 0x52d   : > { %p1104_p8 = pnand %p1107_p7, %p1392_p9 }
 0x52f   : > { %1252 = dma.done.wait (!%p1104_p8), %s875_s24, 128  }
 0x530   : > { %1254 = vsyncadd (!%p1104_p8), %s875_s24, 4294967168  ;;  %s20_s8 = sadd.s32 1, %s1558_s9   ;;  %s1561_s26 = sld [smem:[#allocation11_spill]] }
 0x531   : > { %p17_p10 = scmp.ge.s32.totalorder %s20_s8, 10   ;;  %s1562_s27 = sld [smem:[#allocation18_spill]] }
 0x532   : > { %s1563_s13 = sld [smem:[#allocation12_spill]]  ;;  %s1564_s28 = sld [smem:[#allocation13_spill]] }
 0x533   : > { %s1565_s29 = sld [smem:[#allocation15_spill]]  ;;  %s1566_s30 = sld [smem:[#allocation16_spill]] }
 0x534   : > { %s1567_s24 = smov %s1261_s25  ;;  %19 = sbr.rel (!%p17_p10) target bundleno = 7 (0x7), region = 118 }
 0x536   : > { %s1568_s25 = smov %s1561_s26 }
 0x537   : > { %s1569_s26 = smov %s1562_s27 }
 0x538   : > { %s1570_s27 = smov %s1563_s13 }
 0x53b   :  { %880 = vsyncpa [#allocation8], 1 }
 0x53c   :  { %882 = vsyncpa [#allocation8 + $0x1], 1 }

</bundles_post_ra>
